<compile_context>
chip_gen: v7x
topology: tpu7x:2x2x1
jax: 0.10.0
libtpu: 0.0.40
codegen_flags: <defaults>
</compile_context>

<pallas_src>
import functools

import jax
import jax.numpy as jnp
import numpy as np
from jax.experimental import pallas as pl
from jax.experimental.pallas import tpu as pltpu

_NEG = -1e9            # logit padding for unused class sublanes (exp -> 0, stays finite)
_TILE_ROWS = 32768     # preferred rows (lanes) per grid step
_BLOCK_BYTES = 2 << 20 # per-input-block VMEM budget used to auto-shrink the tile


def _round_up(x, m):
    return ((x + m - 1) // m) * m


def _fused_ce_kernel(preds_ref, true_ref, out_ref, *, bx, be, by):
    """One grid step: a (d_pad, tile) lane-dense slab of rows (rows on the lane axis).

    Row layout along the fused lane axis: [X rows | E rows | y rows | padding], with static
    boundaries bx / be / by baked in at trace time.  Writes a (1, 1, 8) partial-sum block:
    [ce_X, ce_E, ce_y, count_X, count_E, count_y, 0, 0].
    """
    preds = preds_ref[...].astype(jnp.float32)   # (d_pad, tile) logits
    true = true_ref[...].astype(jnp.float32)     # (d_pad, tile) one-hot-ish targets
    tile = preds.shape[1]

    # Global row index of every lane in this tile -> per-row stream membership masks.
    ridx = pl.program_id(0) * tile + jax.lax.broadcasted_iota(jnp.int32, (1, tile), 1)
    in_x = (ridx < bx).astype(jnp.float32)
    in_e = jnp.logical_and(ridx >= bx, ridx < be).astype(jnp.float32)
    in_y = jnp.logical_and(ridx >= be, ridx < by).astype(jnp.float32)

    # Targets are one-hot (or all-zero for masked nodes/edges):
    #   picked  = logits[argmax(target)]  == sum(logits * one-hot)
    #   content = 1 for a real one-hot row, 0 for an all-zero (masked) row.
    picked = jnp.sum(preds * true, axis=0, keepdims=True)       # (1, tile)
    content = jnp.sum(true, axis=0, keepdims=True)               # (1, tile)

    # Stable log-sum-exp over the (sublane) class axis.  Padded class sublanes hold -1e9
    # (exp -> 0 exactly); fully padded rows hold 0 everywhere, giving a finite ce that the
    # group masks zero out -- no NaN/Inf can leak through the multiplications below.
    pmax = jnp.max(preds, axis=0, keepdims=True)                 # (1, tile)
    lse = pmax + jnp.log(jnp.sum(jnp.exp(preds - pmax), axis=0, keepdims=True))
    ce = lse - picked                                            # (1, tile)

    mask_x = in_x * content     # node loss: drop all-zero target rows
    mask_e = in_e * content     # edge loss: drop all-zero target rows
    mask_y = in_y               # y loss: no content mask in the reference

    vals = (jnp.sum(ce * mask_x, axis=(0, 1), keepdims=True),
            jnp.sum(ce * mask_e, axis=(0, 1), keepdims=True),
            jnp.sum(ce * mask_y, axis=(0, 1), keepdims=True),
            jnp.sum(mask_x, axis=(0, 1), keepdims=True),
            jnp.sum(mask_e, axis=(0, 1), keepdims=True),
            jnp.sum(mask_y, axis=(0, 1), keepdims=True))

    cols = jax.lax.broadcasted_iota(jnp.int32, (1, 1, 8), 2)
    acc = jnp.zeros((1, 1, 8), jnp.float32)
    for i, v in enumerate(vals):
        acc = acc + jnp.where(cols == i, v, 0.0)
    out_ref[...] = acc


def _fused_masked_ce(streams, *, tile_rows=_TILE_ROWS):
    """streams: 3-slot list (X, E, y) of (preds, true) pairs or None (excluded stream).

    Returns (ce_sum_X, ce_sum_E, ce_sum_y, count_X, count_E, count_y) as f32 scalars.
    """
    d_pad = max(8, _round_up(max(s[1].shape[-1] for s in streams if s is not None), 8))

    parts_p, parts_t, counts = [], [], []
    for s in streams:
        if s is None:
            counts.append(0)
            continue
        preds, true = s
        d = true.shape[-1]
        pf = preds.reshape(-1, d).T          # (d, rows): rows -> lane axis (lane-dense)
        tf = true.reshape(-1, d).T
        if d < d_pad:
            pf = jnp.pad(pf, ((0, d_pad - d), (0, 0)), constant_values=_NEG)
            tf = jnp.pad(tf, ((0, d_pad - d), (0, 0)))
        parts_p.append(pf)
        parts_t.append(tf)
        counts.append(pf.shape[1])

    bx = counts[0]
    be = counts[0] + counts[1]
    by = counts[0] + counts[1] + counts[2]
    n_tot = by

    # Tile sizing: as many rows as the per-block VMEM budget allows (amortizes per-step
    # pipeline overhead), capped by the (128-aligned) total row count.
    budget_rows = max(128, (_BLOCK_BYTES // (d_pad * 4)) // 128 * 128)
    tile = min(tile_rows, budget_rows, _round_up(n_tot, 128))
    n_pad = _round_up(n_tot, tile)
    num_tiles = n_pad // tile

    preds_all = parts_p[0] if len(parts_p) == 1 else jnp.concatenate(parts_p, axis=1)
    true_all = parts_t[0] if len(parts_t) == 1 else jnp.concatenate(parts_t, axis=1)
    if n_pad > n_tot:
        preds_all = jnp.pad(preds_all, ((0, 0), (0, n_pad - n_tot)))
        true_all = jnp.pad(true_all, ((0, 0), (0, n_pad - n_tot)))

    kernel = functools.partial(_fused_ce_kernel, bx=bx, be=be, by=by)
    partials = pl.pallas_call(
        kernel,
        out_shape=jax.ShapeDtypeStruct((num_tiles, 1, 8), jnp.float32),
        grid=(num_tiles,),
        in_specs=[pl.BlockSpec((d_pad, tile), lambda i: (0, i)),
                  pl.BlockSpec((d_pad, tile), lambda i: (0, i))],
        out_specs=pl.BlockSpec((1, 1, 8), lambda i: (i, 0, 0)),
        compiler_params=pltpu.CompilerParams(dimension_semantics=("parallel",)),
    )(preds_all, true_all)

    sums = jnp.sum(partials, axis=(0, 1))    # (8,)
    return sums[0], sums[1], sums[2], sums[3], sums[4], sums[5]


class TrainLossDiscrete:
    """JAX/Pallas port of TrainLossDiscrete.forward (masked cross-entropy train loss)."""

    def __init__(self, lambda_train):
        self.lambda_train = lambda_train

    def __call__(self, masked_pred_X, masked_pred_E, pred_y, true_X, true_E, true_y, log=False):
        raw = [(masked_pred_X, true_X), (masked_pred_E, true_E), (pred_y, true_y)]
        streams = [(p, t) if t.size > 0 else None for p, t in raw]

        if all(s is None for s in streams):
            return jnp.float32(0.0)

        ce_x, ce_e, ce_y, n_x, n_e, n_y = _fused_masked_ce(streams)

        def mean(ce, cnt):
            # Counts are exact integers in f32; max(.,1) only guards the zero-selected-rows
            # edge case (which is NaN in the PyTorch reference).
            return ce / jnp.maximum(cnt, 1.0)

        loss_X = mean(ce_x, n_x) if streams[0] is not None else jnp.float32(0.0)
        loss_E = mean(ce_e, n_e) if streams[1] is not None else jnp.float32(0.0)
        loss_y = mean(ce_y, n_y) if streams[2] is not None else jnp.float32(0.0)

        # TODO(synk): wandb / torchmetrics epoch-state logging (side effects) intentionally omitted.
        return loss_X + self.lambda_train[0] * loss_E + self.lambda_train[1] * loss_y


def _reference_loss(masked_pred_X, masked_pred_E, pred_y, true_X, true_E, true_y, lambda_train):
    """Pure-jnp reference mirroring the PyTorch semantics (verification only, eager mode)."""
    def mean_ce(preds, true, content_mask):
        preds = preds.reshape(-1, preds.shape[-1])
        true = true.reshape(-1, true.shape[-1])
        if content_mask:
            mask = jnp.any(true != 0.0, axis=-1)
            preds = preds[mask]
            true = true[mask]
        tgt = jnp.argmax(true, axis=-1)
        lse = jax.scipy.special.logsumexp(preds, axis=-1)
        picked = jnp.take_along_axis(preds, tgt[:, None], axis=-1)[:, 0]
        return jnp.sum(lse - picked) / preds.shape[0]

    lx = mean_ce(masked_pred_X, true_X, True) if true_X.size > 0 else 0.0
    le = mean_ce(masked_pred_E, true_E, True) if true_E.size > 0 else 0.0
    ly = mean_ce(pred_y, true_y, False) if true_y.size > 0 else 0.0
    return lx + lambda_train[0] * le + lambda_train[1] * ly


if __name__ == "__main__":
    key = jax.random.PRNGKey(0)
    bs, n, dx, dx_c, de = 2, 8, 3, 5, 5

    k1, k2, k3, k4, k5, k6, k7 = jax.random.split(key, 7)

    masked_pred_X = jax.random.normal(k1, (bs, n, dx, dx_c), dtype=jnp.float32)
    masked_pred_E = jax.random.normal(k2, (bs, n, n, de), dtype=jnp.float32)

    # One-hot targets with some rows fully zeroed (masked-out nodes/edges).
    x_idx = jax.random.randint(k3, (bs, n, dx), 0, dx_c)
    true_X = jax.nn.one_hot(x_idx, dx_c, dtype=jnp.float32)
    x_keep = jax.random.bernoulli(k4, 0.7, (bs, n, dx, 1)).astype(jnp.float32)
    true_X = true_X * x_keep

    e_idx = jax.random.randint(k5, (bs, n, n), 0, de)
    true_E = jax.nn.one_hot(e_idx, de, dtype=jnp.float32)
    e_keep = jax.random.bernoulli(k6, 0.6, (bs, n, n, 1)).astype(jnp.float32)
    true_E = true_E * e_keep

    # Case 1: dy = 0 (typical DiGress setup -> y-loss branch inactive).
    dy0 = 0
    pred_y0 = jax.random.normal(k7, (bs, dy0), dtype=jnp.float32)
    true_y0 = jnp.zeros((bs, dy0), dtype=jnp.float32)
    lam0 = [5.0, 0.0]
    loss0 = TrainLossDiscrete(lam0)(masked_pred_X, masked_pred_E, pred_y0,
                                    true_X, true_E, true_y0, log=False)
    loss0 = jax.block_until_ready(loss0)
    ref0 = _reference_loss(masked_pred_X, masked_pred_E, pred_y0,
                           true_X, true_E, true_y0, lam0)
    np.testing.assert_allclose(np.asarray(loss0), np.asarray(ref0), rtol=1e-5, atol=1e-5)

    # Case 2: dy = 3 (exercises the fused y stream with a different class width).
    dy1 = 3
    pred_y1 = jax.random.normal(k7, (bs, dy1), dtype=jnp.float32)
    y_idx = jax.random.randint(k4, (bs,), 0, dy1)
    true_y1 = jax.nn.one_hot(y_idx, dy1, dtype=jnp.float32)
    lam1 = [5.0, 2.0]
    loss1 = TrainLossDiscrete(lam1)(masked_pred_X, masked_pred_E, pred_y1,
                                    true_X, true_E, true_y1, log=False)
    loss1 = jax.block_until_ready(loss1)
    ref1 = _reference_loss(masked_pred_X, masked_pred_E, pred_y1,
                           true_X, true_E, true_y1, lam1)
    np.testing.assert_allclose(np.asarray(loss1), np.asarray(ref1), rtol=1e-5, atol=1e-5)

    print("KERNEL_OK")
</pallas_src>

<mosaic_0001>
module attributes {stable_mosaic.version = 11 : i64} {
  func.func @_fused_ce_kernel(%arg0: i32, %arg1: memref<8x256xf32, #tpu.memory_space<vmem>>, %arg2: memref<8x256xf32, #tpu.memory_space<vmem>>, %arg3: memref<1x1x8xf32, #tpu.memory_space<vmem>>) attributes {dimension_semantics = [#tpu.dimension_semantics<parallel>], iteration_bounds = array<i64: 1>, scalar_prefetch = 0 : i64, scratch_operands = 0 : i64, tpu.core_type = #tpu.core_type<tc>, window_params = [{transform_indices = @transform_0, window_bounds = array<i64: 8, 256>}, {transform_indices = @transform_1, window_bounds = array<i64: 8, 256>}, {transform_indices = @transform_2, window_bounds = array<i64: 1, 1, 8>}]} {
    %c0 = arith.constant 0 : index
    %c0_0 = arith.constant 0 : index
    %0 = vector.load %arg1[%c0, %c0_0] : memref<8x256xf32, #tpu.memory_space<vmem>>, vector<8x256xf32>
    %c0_1 = arith.constant 0 : index
    %c0_2 = arith.constant 0 : index
    %1 = vector.load %arg2[%c0_1, %c0_2] : memref<8x256xf32, #tpu.memory_space<vmem>>, vector<8x256xf32>
    %c256_i32 = arith.constant 256 : i32
    %2 = arith.muli %arg0, %c256_i32 : i32
    %3 = tpu.iota {dimensions = array<i32: 1>} : vector<1x256xi32>
    %4 = vector.broadcast %2 : i32 to vector<1x256xi32>
    %5 = arith.addi %4, %3 : vector<1x256xi32>
    %c48_i32 = arith.constant 48 : i32
    %6 = vector.broadcast %c48_i32 : i32 to vector<1x256xi32>
    %7 = arith.cmpi slt, %5, %6 : vector<1x256xi32>
    %8 = arith.extui %7 : vector<1x256xi1> to vector<1x256xi32>
    %9 = arith.sitofp %8 : vector<1x256xi32> to vector<1x256xf32>
    %c48_i32_3 = arith.constant 48 : i32
    %10 = vector.broadcast %c48_i32_3 : i32 to vector<1x256xi32>
    %11 = arith.cmpi sge, %5, %10 : vector<1x256xi32>
    %c176_i32 = arith.constant 176 : i32
    %12 = vector.broadcast %c176_i32 : i32 to vector<1x256xi32>
    %13 = arith.cmpi slt, %5, %12 : vector<1x256xi32>
    %14 = arith.andi %11, %13 : vector<1x256xi1>
    %15 = arith.extui %14 : vector<1x256xi1> to vector<1x256xi32>
    %16 = arith.sitofp %15 : vector<1x256xi32> to vector<1x256xf32>
    %c176_i32_4 = arith.constant 176 : i32
    %17 = vector.broadcast %c176_i32_4 : i32 to vector<1x256xi32>
    %18 = arith.cmpi sge, %5, %17 : vector<1x256xi32>
    %c176_i32_5 = arith.constant 176 : i32
    %19 = vector.broadcast %c176_i32_5 : i32 to vector<1x256xi32>
    %20 = arith.cmpi slt, %5, %19 : vector<1x256xi32>
    %21 = arith.andi %18, %20 : vector<1x256xi1>
    %22 = arith.extui %21 : vector<1x256xi1> to vector<1x256xi32>
    %23 = arith.sitofp %22 : vector<1x256xi32> to vector<1x256xf32>
    %24 = arith.mulf %0, %1 : vector<8x256xf32>
    %cst = arith.constant dense<0.000000e+00> : vector<256xf32>
    %25 = vector.multi_reduction <add>, %24, %cst [0] : vector<8x256xf32> to vector<256xf32>
    %26 = vector.shape_cast %25 : vector<256xf32> to vector<1x256xf32>
    %cst_6 = arith.constant dense<0.000000e+00> : vector<256xf32>
    %27 = vector.multi_reduction <add>, %1, %cst_6 [0] : vector<8x256xf32> to vector<256xf32>
    %28 = vector.shape_cast %27 : vector<256xf32> to vector<1x256xf32>
    %cst_7 = arith.constant dense<0xFF800000> : vector<256xf32>
    %29 = vector.multi_reduction <maximumf>, %0, %cst_7 [0] : vector<8x256xf32> to vector<256xf32>
    %30 = vector.shape_cast %29 : vector<256xf32> to vector<1x256xf32>
    %31 = vector.broadcast %30 : vector<1x256xf32> to vector<8x256xf32>
    %32 = arith.subf %0, %31 : vector<8x256xf32>
    %33 = math.exp %32 : vector<8x256xf32>
    %cst_8 = arith.constant dense<0.000000e+00> : vector<256xf32>
    %34 = vector.multi_reduction <add>, %33, %cst_8 [0] : vector<8x256xf32> to vector<256xf32>
    %35 = vector.shape_cast %34 : vector<256xf32> to vector<1x256xf32>
    %36 = math.log %35 : vector<1x256xf32>
    %37 = arith.addf %30, %36 : vector<1x256xf32>
    %38 = arith.subf %37, %26 : vector<1x256xf32>
    %39 = arith.mulf %9, %28 : vector<1x256xf32>
    %40 = arith.mulf %16, %28 : vector<1x256xf32>
    %41 = arith.mulf %38, %39 : vector<1x256xf32>
    %42 = vector.shape_cast %41 : vector<1x256xf32> to vector<1x1x256xf32>
    %cst_9 = arith.constant dense<0.000000e+00> : vector<1xf32>
    %43 = vector.multi_reduction <add>, %42, %cst_9 [1, 2] : vector<1x1x256xf32> to vector<1xf32>
    %44 = vector.shape_cast %43 : vector<1xf32> to vector<1x1x1xf32>
    %45 = vector.extract %44[0, 0, 0] : f32 from vector<1x1x1xf32>
    %46 = vector.broadcast %45 : f32 to vector<1x1xf32>
    %47 = arith.mulf %38, %40 : vector<1x256xf32>
    %48 = vector.shape_cast %47 : vector<1x256xf32> to vector<1x1x256xf32>
    %cst_10 = arith.constant dense<0.000000e+00> : vector<1xf32>
    %49 = vector.multi_reduction <add>, %48, %cst_10 [1, 2] : vector<1x1x256xf32> to vector<1xf32>
    %50 = vector.shape_cast %49 : vector<1xf32> to vector<1x1x1xf32>
    %51 = vector.extract %50[0, 0, 0] : f32 from vector<1x1x1xf32>
    %52 = vector.broadcast %51 : f32 to vector<1x1xf32>
    %53 = arith.mulf %38, %23 : vector<1x256xf32>
    %54 = vector.shape_cast %53 : vector<1x256xf32> to vector<1x1x256xf32>
    %cst_11 = arith.constant dense<0.000000e+00> : vector<1xf32>
    %55 = vector.multi_reduction <add>, %54, %cst_11 [1, 2] : vector<1x1x256xf32> to vector<1xf32>
    %56 = vector.shape_cast %55 : vector<1xf32> to vector<1x1x1xf32>
    %57 = vector.extract %56[0, 0, 0] : f32 from vector<1x1x1xf32>
    %58 = vector.broadcast %57 : f32 to vector<1x1xf32>
    %59 = vector.shape_cast %39 : vector<1x256xf32> to vector<1x1x256xf32>
    %cst_12 = arith.constant dense<0.000000e+00> : vector<1xf32>
    %60 = vector.multi_reduction <add>, %59, %cst_12 [1, 2] : vector<1x1x256xf32> to vector<1xf32>
    %61 = vector.shape_cast %60 : vector<1xf32> to vector<1x1x1xf32>
    %62 = vector.extract %61[0, 0, 0] : f32 from vector<1x1x1xf32>
    %63 = vector.broadcast %62 : f32 to vector<1x1xf32>
    %64 = vector.shape_cast %40 : vector<1x256xf32> to vector<1x1x256xf32>
    %cst_13 = arith.constant dense<0.000000e+00> : vector<1xf32>
    %65 = vector.multi_reduction <add>, %64, %cst_13 [1, 2] : vector<1x1x256xf32> to vector<1xf32>
    %66 = vector.shape_cast %65 : vector<1xf32> to vector<1x1x1xf32>
    %67 = vector.extract %66[0, 0, 0] : f32 from vector<1x1x1xf32>
    %68 = vector.broadcast %67 : f32 to vector<1x1xf32>
    %69 = vector.shape_cast %23 : vector<1x256xf32> to vector<1x1x256xf32>
    %cst_14 = arith.constant dense<0.000000e+00> : vector<1xf32>
    %70 = vector.multi_reduction <add>, %69, %cst_14 [1, 2] : vector<1x1x256xf32> to vector<1xf32>
    %71 = vector.shape_cast %70 : vector<1xf32> to vector<1x1x1xf32>
    %72 = vector.extract %71[0, 0, 0] : f32 from vector<1x1x1xf32>
    %73 = vector.broadcast %72 : f32 to vector<1x1xf32>
    %74 = tpu.iota {dimensions = array<i32: 2>} : vector<1x1x8xi32>
    %cst_15 = arith.constant 0.000000e+00 : f32
    %75 = vector.broadcast %cst_15 : f32 to vector<1x1x8xf32>
    %c0_i32 = arith.constant 0 : i32
    %76 = vector.broadcast %c0_i32 : i32 to vector<1x1x8xi32>
    %77 = arith.cmpi eq, %74, %76 : vector<1x1x8xi32>
    %cst_16 = arith.constant 0.000000e+00 : f32
    %78 = vector.shape_cast %46 : vector<1x1xf32> to vector<1x1x1xf32>
    %79 = vector.broadcast %78 : vector<1x1x1xf32> to vector<1x1x8xf32>
    %80 = vector.broadcast %cst_16 : f32 to vector<1x1x8xf32>
    %81 = arith.select %77, %79, %80 : vector<1x1x8xi1>, vector<1x1x8xf32>
    %82 = arith.addf %75, %81 : vector<1x1x8xf32>
    %c1_i32 = arith.constant 1 : i32
    %83 = vector.broadcast %c1_i32 : i32 to vector<1x1x8xi32>
    %84 = arith.cmpi eq, %74, %83 : vector<1x1x8xi32>
    %cst_17 = arith.constant 0.000000e+00 : f32
    %85 = vector.shape_cast %52 : vector<1x1xf32> to vector<1x1x1xf32>
    %86 = vector.broadcast %85 : vector<1x1x1xf32> to vector<1x1x8xf32>
    %87 = vector.broadcast %cst_17 : f32 to vector<1x1x8xf32>
    %88 = arith.select %84, %86, %87 : vector<1x1x8xi1>, vector<1x1x8xf32>
    %89 = arith.addf %82, %88 : vector<1x1x8xf32>
    %c2_i32 = arith.constant 2 : i32
    %90 = vector.broadcast %c2_i32 : i32 to vector<1x1x8xi32>
    %91 = arith.cmpi eq, %74, %90 : vector<1x1x8xi32>
    %cst_18 = arith.constant 0.000000e+00 : f32
    %92 = vector.shape_cast %58 : vector<1x1xf32> to vector<1x1x1xf32>
    %93 = vector.broadcast %92 : vector<1x1x1xf32> to vector<1x1x8xf32>
    %94 = vector.broadcast %cst_18 : f32 to vector<1x1x8xf32>
    %95 = arith.select %91, %93, %94 : vector<1x1x8xi1>, vector<1x1x8xf32>
    %96 = arith.addf %89, %95 : vector<1x1x8xf32>
    %c3_i32 = arith.constant 3 : i32
    %97 = vector.broadcast %c3_i32 : i32 to vector<1x1x8xi32>
    %98 = arith.cmpi eq, %74, %97 : vector<1x1x8xi32>
    %cst_19 = arith.constant 0.000000e+00 : f32
    %99 = vector.shape_cast %63 : vector<1x1xf32> to vector<1x1x1xf32>
    %100 = vector.broadcast %99 : vector<1x1x1xf32> to vector<1x1x8xf32>
    %101 = vector.broadcast %cst_19 : f32 to vector<1x1x8xf32>
    %102 = arith.select %98, %100, %101 : vector<1x1x8xi1>, vector<1x1x8xf32>
    %103 = arith.addf %96, %102 : vector<1x1x8xf32>
    %c4_i32 = arith.constant 4 : i32
    %104 = vector.broadcast %c4_i32 : i32 to vector<1x1x8xi32>
    %105 = arith.cmpi eq, %74, %104 : vector<1x1x8xi32>
    %cst_20 = arith.constant 0.000000e+00 : f32
    %106 = vector.shape_cast %68 : vector<1x1xf32> to vector<1x1x1xf32>
    %107 = vector.broadcast %106 : vector<1x1x1xf32> to vector<1x1x8xf32>
    %108 = vector.broadcast %cst_20 : f32 to vector<1x1x8xf32>
    %109 = arith.select %105, %107, %108 : vector<1x1x8xi1>, vector<1x1x8xf32>
    %110 = arith.addf %103, %109 : vector<1x1x8xf32>
    %c5_i32 = arith.constant 5 : i32
    %111 = vector.broadcast %c5_i32 : i32 to vector<1x1x8xi32>
    %112 = arith.cmpi eq, %74, %111 : vector<1x1x8xi32>
    %cst_21 = arith.constant 0.000000e+00 : f32
    %113 = vector.shape_cast %73 : vector<1x1xf32> to vector<1x1x1xf32>
    %114 = vector.broadcast %113 : vector<1x1x1xf32> to vector<1x1x8xf32>
    %115 = vector.broadcast %cst_21 : f32 to vector<1x1x8xf32>
    %116 = arith.select %112, %114, %115 : vector<1x1x8xi1>, vector<1x1x8xf32>
    %117 = arith.addf %110, %116 : vector<1x1x8xf32>
    %c0_22 = arith.constant 0 : index
    %c0_23 = arith.constant 0 : index
    %c0_24 = arith.constant 0 : index
    %118 = vector.load %arg3[%c0_22, %c0_23, %c0_24] : memref<1x1x8xf32, #tpu.memory_space<vmem>>, vector<1x1x8xf32>
    tpu.vector_store %arg3[%c0_22, %c0_23, %c0_24], %117 {strides = array<i32>} : memref<1x1x8xf32, #tpu.memory_space<vmem>>, vector<1x1x8xf32>,
    return
  }
  func.func @transform_0(%arg0: i32) -> (i32, i32) {
    %c0_i32 = arith.constant 0 : i32
    %c0_i32_0 = arith.constant 0 : i32
    return %c0_i32, %arg0 : i32, i32
  }
  func.func @transform_1(%arg0: i32) -> (i32, i32) {
    %c0_i32 = arith.constant 0 : i32
    %c0_i32_0 = arith.constant 0 : i32
    return %c0_i32, %arg0 : i32, i32
  }
  func.func @transform_2(%arg0: i32) -> (i32, i32, i32) {
    %c0_i32 = arith.constant 0 : i32
    %c0_i32_0 = arith.constant 0 : i32
    %c0_i32_1 = arith.constant 0 : i32
    return %arg0, %c0_i32, %c0_i32_0 : i32, i32, i32
  }
}

</mosaic_0001>

<bundles_post_ra>
// kernel: tpu_custom_call.1
= control target key start
LH: loop header
LB: loop body
LE: loop exit
PB: predicated region body
PF: predicated region fallthrough
CT: control target
= control target key end

     0   :  { %7 = vsyncpa [#allocation3], 0  ;;  %s445_s0 = inlined_call_operand.hbm [shape: f32[8,256], index: 0, kind: input, shape index: {}]   ;;  %s446_s1 = inlined_call_operand.hbm [shape: f32[8,256], index: 1, kind: input, shape index: {}]   ;;  %s447_s2 = inlined_call_operand.hbm [shape: f32[1,1,8], index: 2, kind: output, shape index: {}]  }
   0x1   :  { %8 = vsyncpa [#allocation6], 0 }
   0x2   :  { %9 = vsyncpa [#allocation4], 0  ;;  %s360_s9 = smov [#allocation2]   ;;  %s361_s11 = smov [#allocation5]  }
   0x3   :  { %s16_s10 = sshll.u32 %s360_s9, 4  ;;  %s26_s12 = sshll.u32 %s361_s11, 4  ;;  %s17_s10 = int_to_ptr.vmem [resolvable:$true] %s16_s10  ;;  %s27_s12 = int_to_ptr.vmem [resolvable:$true] %s26_s12 }
   0x4   :  { %s288_s15 = scalar_lea.hbm %s445_s0, 256 }
   0x5   :  { %p289_p0 = scmp.ne.s32.totalorder %s445_s0, %s288_s15  ;;  %p292_p1 = scmp.lt.u32.totalorder %s288_s15, %s445_s0 }
   0x7   :  { %p294_p2 = pnand %p292_p1, %p289_p0 }
   0x9   :  { %297 = shalt.err (!%p294_p2)
}
   0xa   :  { %s298_s20 = scalar_lea.vmem %s17_s10, 256  ;;  %p303_p4 = scmp.lt.s32.totalorder %s17_s10, %s17_s10 }
   0xb   :  { %p299_p3 = scmp.ne.s32.totalorder %s17_s10, %s298_s20  ;;  %p304_p5 = scmp.lt.s32.totalorder %s298_s20, %s298_s20 }
   0xd   :  { %p305_p6 = por %p304_p5, %p303_p4 }
   0xf   :  { %p306_p7 = pnand %p305_p6, %p299_p3 }
  0x11   :  { %309 = shalt.err (!%p306_p7)
}
  0x12   :  { %19 = dma.hbm_to_vmem [thread:$0]  %s445_s0, 256, %s17_s10, [#allocation3]  }
  0x13   :  { %s310_s25 = scalar_lea.hbm %s446_s1, 256 }
  0x14   :  { %p311_p8 = scmp.ne.s32.totalorder %s446_s1, %s310_s25  ;;  %p314_p9 = scmp.lt.u32.totalorder %s310_s25, %s446_s1 }
  0x16   :  { %p316_p10 = pnand %p314_p9, %p311_p8 }
  0x18   :  { %319 = shalt.err (!%p316_p10)
}
  0x19   :  { %s320_s30 = scalar_lea.vmem %s27_s12, 256  ;;  %p325_p12 = scmp.lt.s32.totalorder %s27_s12, %s27_s12 }
  0x1a   :  { %p321_p11 = scmp.ne.s32.totalorder %s27_s12, %s320_s30  ;;  %p326_p13 = scmp.lt.s32.totalorder %s320_s30, %s320_s30 }
  0x1c   :  { %p327_p0 = por %p326_p13, %p325_p12 }
  0x1e   :  { %p328_p1 = pnand %p327_p0, %p321_p11 }
  0x20   :  { %331 = shalt.err (!%p328_p1)
}
  0x21   :  { %29 = dma.hbm_to_vmem [thread:$0]  %s446_s1, 256, %s27_s12, [#allocation6]  }
  0x22   :  { %354 = dma.done.wait [#allocation3], 256  }
  0x23   :  { %355 = vsyncadd [#allocation3], 4294967040 }
  0x24   :  { %356 = dma.done.wait [#allocation6], 256  }
  0x25   :  { %357 = vsyncadd [#allocation6], 4294967040  ;;  %v36_v0 = vld [vmem:[#allocation2] sm:$0xff]  ;;  %v37_v1 = vld [vmem:[#allocation2 + $0x8] sm:$0xff]  ;;  %v41_v41 = vlaneseq  ;;  %v362_v61 = vmov 0.0   ;;  %vm141_vm5 = vcmask 1040384  }
  0x26   :  { %v97_v2 = vrot.slane %v36_v0, 4  ;;  %v103_v3 = vrot.slane %v37_v1, 4  ;;  %v38_v18 = vld [vmem:[#allocation5] sm:$0xff]  ;;  %v39_v19 = vld [vmem:[#allocation5 + $0x8] sm:$0xff]  ;;  %s363_s9 = smov [#allocation7]   ;;  %vm242_vm12 = vcmask 57344  }
  0x27   :  { %v71_v21 = vmul.f32 %v38_v18, %v36_v0  ;;  %v72_v23 = vmul.f32 %v39_v19, %v37_v1  ;;  %v85_v26 = vrot.slane %v38_v18, 4  ;;  %v91_v28 = vrot.slane %v39_v19, 4  ;;  %s250_s10 = sshll.u32 %s363_s9, 4  ;;  %s251_s10 = int_to_ptr.vmem [resolvable:$true] %s250_s10 }
  0x28   :  { %v98_v4 = vmax.f32 %v36_v0, %v97_v2  ;;  %v104_v5 = vmax.f32 %v37_v1, %v103_v3  ;;  %v409_v49 = vand.u32 127, %v41_v41  ;;  %s332_s11 = scalar_lea.vmem %s251_s10, 16  ;;  %s336_s12 = scalar_lea.vmem %s251_s10, 32 }
  0x29   :  { %v73_v29 = vrot.slane %v71_v21, 4  ;;  %v79_v31 = vrot.slane %v72_v23, 4  ;;  %v86_v34 = vadd.f32 %v85_v26, %v38_v18  ;;  %v92_v36 = vadd.f32 %v91_v28, %v39_v19  ;;  %p333_p2 = scmp.ne.s32.totalorder %s251_s10, %s332_s11  ;;  %p337_p3 = scmp.lt.s32.totalorder %s251_s10, %s251_s10 }
  0x2a   :  { %v99_v6 = vrot.slane %v98_v4, 2  ;;  %v105_v7 = vrot.slane %v104_v5, 2  ;;  %v43_v54 = vadd.s32 128, %v409_v49  ;;  %vm47_vm0 = vcmp.lt.s32.totalorder %v409_v49, 48  ;;  %p338_p4 = scmp.lt.s32.totalorder %s336_s12, %s332_s11 }
  0x2b   :  { %v74_v37 = vadd.f32 %v73_v29, %v71_v21  ;;  %v80_v39 = vadd.f32 %v79_v31, %v72_v23  ;;  %v87_v43 = vrot.slane %v86_v34, 2  ;;  %v93_v45 = vrot.slane %v92_v36, 2 }
  0x2c   :  { %v100_v8 = vmax.f32 %v98_v4, %v99_v6  ;;  %v106_v9 = vmax.f32 %v104_v5, %v105_v7  ;;  %vm53_vm1 = vcmp.ge.s32.totalorder %v409_v49, 48  ;;  %vm56_vm2 = vcmp.lt.s32.totalorder %v43_v54, 176  ;;  %p339_p5 = por %p338_p4, %p337_p3 }
  0x2d   :  { %v75_v46 = vrot.slane %v74_v37, 2  ;;  %v81_v48 = vrot.slane %v80_v39, 2  ;;  %v88_v50 = vadd.f32 %v87_v43, %v86_v34  ;;  %v94_v51 = vadd.f32 %v93_v45, %v92_v36 }
  0x2e   :  { %v101_v10 = vrot.slane %v100_v8, 1  ;;  %v107_v11 = vrot.slane %v106_v9, 1  ;;  %vm64_vm3 = vcmp.ge.s32.totalorder %v43_v54, 176  ;;  %v260_v62 = vsel %vm47_vm0, 1.0, %v362_v61  ;;  %p340_p6 = pnand %p339_p5, %p333_p2 }
  0x2f   :  { %v76_v52 = vadd.f32 %v75_v46, %v74_v37  ;;  %v82_v53 = vadd.f32 %v81_v48, %v80_v39  ;;  %v89_v55 = vrot.slane %v88_v50, 1  ;;  %v95_v56 = vrot.slane %v94_v51, 1  ;;  %vm66_vm4 = vmand %vm64_vm3, %vm56_vm2 }
  0x30   :  { %v403_v12 = vmax.f32 %v100_v8, %v101_v10  ;;  %v405_v13 = vmax.f32 %v106_v9, %v107_v11  ;;  %v262_v2 = vsel %vm56_vm2, 1.0, %v362_v61  ;;  %vm218_vm6 = vcmp.eq.s32.totalorder %v409_v49, 0 }
  0x31   :  { %v77_v57 = vrot.slane %v76_v52, 1  ;;  %v83_v58 = vrot.slane %v82_v53, 1  ;;  %v90_v59 = vadd.f32 %v89_v55, %v88_v50  ;;  %v96_v63 = vadd.f32 %v95_v56, %v94_v51 }
  0x32   :  { %v109_v14 = vsub.f32 %v36_v0, %v403_v12  ;;  %v110_v15 = vsub.f32 %v37_v1, %v405_v13  ;;  %v261_v0 = vsel %vm53_vm1, 1.0, %v362_v61  ;;  %vm222_vm7 = vcmp.eq.s32.totalorder %v409_v49, 1 }
  0x33   :  { %v78_v3 = vadd.f32 %v77_v57, %v76_v52  ;;  %v84_v5 = vadd.f32 %v83_v58, %v82_v53  ;;  %v135_v8 = vmul.f32 %v260_v62, %v90_v59  ;;  %v137_v9 = vmul.f32 %v261_v0, %v90_v59 }
  0x34   :  { %v111_v16 = vmul.f32 1.442695, %v109_v14  ;;  %v113_v17 = vmul.f32 1.442695, %v110_v15  ;;  %v136_v11 = vmul.f32 0.0, %v96_v63  ;;  %v138_v14 = vmul.f32 %v262_v2, %v96_v63 }
  0x35   :  { %v263_v15 = vsel %vm66_vm4, 1.0, %v362_v61  ;;  %v194_v34 = vsel %vm141_vm5, %v137_v9, 0.0  ;;  %vm226_vm8 = vcmp.eq.s32.totalorder %v409_v49, 2  ;;  %vm230_vm9 = vcmp.eq.s32.totalorder %v409_v49, 3 }
  0x36   :  { %280 = vpow2.f32 %v111_v16  ;;  %v207_v37 = vsel %vm141_vm5, %v263_v15, 0.0  ;;  %vm234_vm10 = vcmp.eq.s32.totalorder %v409_v49, 4  ;;  %vm238_vm11 = vcmp.eq.s32.totalorder %v409_v49, 5 }
  0x37   :  { %282 = vpow2.f32 %v113_v17 }
  0x40   :  { %v281_v20 = vpop.eup %280 }
  0x41   :  { %v283_v22 = vpop.eup %282  ;;  %v115_v24 = vrot.slane %v281_v20, 4 }
  0x42   :  { %v121_v25 = vrot.slane %v283_v22, 4 }
  0x43   :  { %v116_v27 = vadd.f32 %v281_v20, %v115_v24 }
  0x44   :  { %v122_v30 = vadd.f32 %v283_v22, %v121_v25  ;;  %v182_v25 = vsel %vm141_vm5, %v135_v8, 0.0 }
  0x45   :  { %v117_v32 = vrot.slane %v116_v27, 2 }
  0x46   :  { %v123_v33 = vrot.slane %v122_v30, 2 }
  0x47   :  { %v118_v35 = vadd.f32 %v117_v32, %v116_v27 }
  0x48   :  { %v124_v38 = vadd.f32 %v123_v33, %v122_v30 }
  0x49   :  { %v119_v40 = vrot.slane %v118_v35, 1 }
  0x4a   :  { %v125_v42 = vrot.slane %v124_v38, 1 }
  0x4b   :  { %v120_v44 = vadd.f32 %v119_v40, %v118_v35  ;;  %v195_v35 = vsel %vm141_vm5, %v138_v14, 0.0 }
  0x4c   :  { %v126_v47 = vadd.f32 %v125_v42, %v124_v38  ;;  %v196_v36 = vadd.f32 %v195_v35, %v194_v34 }
  0x4d   :  { %284 = vlog2.f32 %v120_v44 }
  0x4e   :  { %286 = vlog2.f32 %v126_v47 }
  0x57   :  { %v285_v60 = vpop.eup %284 }
  0x58   :  { %v287_v1 = vpop.eup %286  ;;  %v128_v4 = vmul.f32 0.6931472, %v285_v60 }
  0x59   :  { %v130_v6 = vmul.f32 0.6931472, %v287_v1 }
  0x5a   :  { %v131_v7 = vadd.f32 %v128_v4, %v403_v12 }
  0x5b   :  { %v132_v10 = vadd.f32 %v130_v6, %v405_v13  ;;  %v183_v13 = vsel %vm141_vm5, %v136_v11, 0.0 }
  0x5c   :  { %v133_v16 = vsub.f32 %v131_v7, %v78_v3  ;;  %v184_v32 = vadd.f32 %v183_v13, %v182_v25 }
  0x5d   :  { %v134_v17 = vsub.f32 %v132_v10, %v84_v5 }
  0x5e   :  { %v168_v18 = vmul.f32 0.0, %v133_v16  ;;  %v139_v19 = vmul.f32 %v135_v8, %v133_v16  ;;  %v154_v20 = vmul.f32 %v137_v9, %v133_v16 }
  0x5f   :  { %v169_v21 = vmul.f32 %v263_v15, %v134_v17  ;;  %v140_v22 = vmul.f32 %v136_v11, %v134_v17  ;;  %v155_v23 = vmul.f32 %v138_v14, %v134_v17 }
  0x60   :  { %v170_v24 = vsel %vm141_vm5, %v168_v18, 0.0  ;;  %v142_v12 = vsel %vm141_vm5, %v139_v19, 0.0  ;;  %v156_v28 = vsel %vm141_vm5, %v154_v20, 0.0 }
  0x61   :  { %v171_v26 = vsel %vm141_vm5, %v169_v21, 0.0  ;;  %v143_v27 = vsel %vm141_vm5, %v140_v22, 0.0  ;;  %v157_v29 = vsel %vm141_vm5, %v155_v23, 0.0 }
  0x62   :  { %v172_v30 = vadd.f32 %v171_v26, %v170_v24  ;;  %v144_v31 = vadd.f32 %v143_v27, %v142_v12  ;;  %v158_v33 = vadd.f32 %v157_v29, %v156_v28 }
  0x64   :  { %173 = vadd.xlane.f32.xlu1 %v172_v30  ;;  %145 = vadd.xlane.f32.xlu0 %v144_v31 }
  0x68   :  { %185 = vadd.xlane.f32.xlu1 %v184_v32  ;;  %159 = vadd.xlane.f32.xlu0 %v158_v33 }
  0x6c   :  { %209 = vadd.xlane.f32.xlu1 %v207_v37  ;;  %197 = vadd.xlane.f32.xlu0 %v196_v36 }
  0xf1   :  { %v174_v38 = vpop.xlane.xlu1 %173  ;;  %v146_v39 = vpop.xlane.xlu0 %145 }
  0xf2   :  { %v175_v40 = vrot.slane %v174_v38, 4  ;;  %v147_v41 = vrot.slane %v146_v39, 4 }
  0xf4   :  { %v176_v42 = vadd.f32 %v175_v40, %v174_v38  ;;  %v148_v43 = vadd.f32 %v147_v41, %v146_v39 }
  0xf5   :  { %v186_v44 = vpop.xlane.xlu1 %185  ;;  %v160_v45 = vpop.xlane.xlu0 %159 }
  0xf6   :  { %v177_v46 = vrot.slane %v176_v42, 2  ;;  %v149_v47 = vrot.slane %v148_v43, 2  ;;  %v187_v48 = vrot.slane %v186_v44, 4  ;;  %v161_v50 = vrot.slane %v160_v45, 4 }
  0xf8   :  { %v188_v51 = vadd.f32 %v187_v48, %v186_v44  ;;  %v162_v52 = vadd.f32 %v161_v50, %v160_v45  ;;  %v150_v53 = vadd.f32 %v149_v47, %v148_v43  ;;  %v178_v56 = vadd.f32 %v177_v46, %v176_v42 }
  0xf9   :  { %v210_v54 = vpop.xlane.xlu1 %209  ;;  %v198_v55 = vpop.xlane.xlu0 %197 }
  0xfa   :  { %v189_v57 = vrot.slane %v188_v51, 2  ;;  %v163_v58 = vrot.slane %v162_v52, 2  ;;  %v211_v59 = vrot.slane %v210_v54, 4  ;;  %v199_v60 = vrot.slane %v198_v55, 4 }
  0xfb   :  { %v151_v61 = vrot.slane %v150_v53, 1  ;;  %v179_v3 = vrot.slane %v178_v56, 1 }
  0xfc   :  { %v212_v62 = vadd.f32 %v211_v59, %v210_v54  ;;  %v200_v63 = vadd.f32 %v199_v60, %v198_v55  ;;  %v164_v0 = vadd.f32 %v163_v58, %v162_v52  ;;  %v190_v1 = vadd.f32 %v189_v57, %v188_v51 }
  0xfd   :  { %v152_v2 = vadd.f32 %v151_v61, %v150_v53  ;;  %v180_v14 = vadd.f32 %v179_v3, %v178_v56 }
  0xfe   :  { %v213_v4 = vrot.slane %v212_v62, 2  ;;  %v201_v5 = vrot.slane %v200_v63, 2  ;;  %v165_v6 = vrot.slane %v164_v0, 1  ;;  %v191_v7 = vrot.slane %v190_v1, 1 }
  0xff   :  { %264 = vpush %v152_v2 }
 0x100   :  { %v214_v8 = vadd.f32 %v213_v4, %v212_v62  ;;  %v202_v9 = vadd.f32 %v201_v5, %v200_v63  ;;  %v166_v10 = vadd.f32 %v165_v6, %v164_v0  ;;  %v192_v11 = vadd.f32 %v191_v7, %v190_v1 }
 0x102   :  { %266 = vpush %v166_v10  ;;  %v203_v15 = vrot.slane %v202_v9, 1  ;;  %v215_v16 = vrot.slane %v214_v8, 1 }
 0x103   :  { %268 = vpush %v180_v14 }
 0x104   :  { %270 = vpush %v192_v11  ;;  %v204_v17 = vadd.f32 %v203_v15, %v202_v9  ;;  %v216_v18 = vadd.f32 %v215_v16, %v214_v8 }
 0x106   :  { %272 = vpush %v204_v17 }
 0x107   :  { %274 = vpush %v216_v18 }
 0x130   :  { %s265_s1 = spop %264 }
 0x131   :  { %v219_v19 = vstv %s265_s1 }
 0x132   :  { %v220_v21 = vsel %vm218_vm6, %v219_v19, 0.0 }
 0x133   :  { %s267_s4 = spop %266 }
 0x134   :  { %v223_v20 = vstv %s267_s4  ;;  %s269_s5 = spop %268 }
 0x135   :  { %v224_v22 = vsel %vm222_vm7, %v223_v20, 0.0  ;;  %v227_v23 = vstv %s269_s5  ;;  %s271_s6 = spop %270 }
 0x136   :  { %v225_v24 = vadd.f32 %v224_v22, %v220_v21  ;;  %v231_v12 = vstv %s271_s6  ;;  %v228_v25 = vsel %vm226_vm8, %v227_v23, 0.0 }
 0x137   :  { %s273_s7 = spop %272  ;;  %v232_v27 = vsel %vm230_vm9, %v231_v12, 0.0 }
 0x138   :  { %v229_v13 = vadd.f32 %v228_v25, %v225_v24  ;;  %v235_v26 = vstv %s273_s7  ;;  %s275_s8 = spop %274 }
 0x139   :  { %v239_v29 = vstv %s275_s8  ;;  %v236_v30 = vsel %vm234_vm10, %v235_v26, 0.0 }
 0x13a   :  { %v233_v28 = vadd.f32 %v232_v27, %v229_v13  ;;  %v240_v32 = vsel %vm238_vm11, %v239_v29, 0.0 }
 0x13c   :  { %v237_v31 = vadd.f32 %v236_v30, %v233_v28 }
 0x13e   :  { %v241_v33 = vadd.f32 %v240_v32, %v237_v31 }
 0x140   :  { %243 = vst.msk [vmem:[#allocation7] sm:$0x1] %vm242_vm12, %v241_v33 }
 0x141   :  { %343 = shalt.err (!%p340_p6)
}
 0x142   :  { %s344_s15 = scalar_lea.hbm %s447_s2, 16 }
 0x143   :  { %p345_p7 = scmp.ne.s32.totalorder %s447_s2, %s344_s15  ;;  %p348_p8 = scmp.lt.u32.totalorder %s344_s15, %s447_s2 }
 0x145   :  { %p350_p9 = pnand %p348_p8, %p345_p7 }
 0x147   :  { %353 = shalt.err (!%p350_p9)
}
 0x148   :  { %253 = dma.vmem_to_hbm [thread:$0]  %s251_s10, 16, %s447_s2, [#allocation4]  }
 0x149   :  { %358 = dma.done.wait [#allocation4], 16  }
 0x14a   :  { %359 = vsyncadd [#allocation4], 4294967280 }
 0x14b   :  { %257 = vsyncpa [#allocation3], 1 }
 0x14c   :  { %258 = vsyncpa [#allocation6], 1 }
 0x14d   :  { %259 = vsyncpa [#allocation4], 1 }

</bundles_post_ra>
